<compile_context>
chip_gen: v6e
topology: v6e:2x2x1
jax: 0.10.0
libtpu: 0.0.40
codegen_flags: <defaults>
</compile_context>

<pallas_src>
import jax
import jax.numpy as jnp
import numpy as np
from jax import lax
from jax.experimental import pallas as pl
from jax.experimental.pallas import tpu as pltpu

# ----------------------------------------------------------------------------
# Problem sizes (small, consistent with the module)
# ----------------------------------------------------------------------------
N, C, H, W = 2, 8, 8, 8          # batch, cell channels C, spatial
C_PREV_PREV, C_PREV = 8, 8
M = N * H * W                    # 128 -> the lane-dense axis used in-kernel
BN_EPS = 1e-5

GENOTYPE = {
    "normal": [
        (("nor_conv_3x3", 0), ("nor_conv_1x1", 1)),
        (("skip_connect", 0), ("avg_pool_3x3", 2)),
        (("nor_conv_1x1", 1), ("skip_connect", 3)),
    ],
    "normal_concat": [2, 3, 4],
}

# ----------------------------------------------------------------------------
# Host-side constant operators (3x3 shift matrices / avg-pool matrix)
# ----------------------------------------------------------------------------
def _build_shift_matrices(n, h, w):
    """S[tap, m_src, m_dst] = 1 iff 3x3-conv tap (di,dj) of output pixel m_dst
    reads input pixel m_src (stride 1, zero pad 1).  tap = di*3 + dj,
    m = b*h*w + hh*w + ww."""
    m = n * h * w
    s = np.zeros((9, m, m), np.float32)
    for di in range(3):
        for dj in range(3):
            t = di * 3 + dj
            for b in range(n):
                for hh in range(h):
                    for ww in range(w):
                        sh, sw = hh + di - 1, ww + dj - 1
                        if 0 <= sh < h and 0 <= sw < w:
                            s[t, b * h * w + sh * w + sw,
                              b * h * w + hh * w + ww] = 1.0
    return jnp.asarray(s)


def _build_avgpool_matrix(n, h, w):
    """AvgPool2d(3, stride=1, pad=1, count_include_pad=False) as one matmul:
    P[m_src, m_dst] = 1/valid_count(m_dst) for every valid tap."""
    m = n * h * w
    p = np.zeros((m, m), np.float32)
    for b in range(n):
        for hh in range(h):
            for ww in range(w):
                taps = [(hh + di - 1, ww + dj - 1)
                        for di in range(3) for dj in range(3)]
                valid = [(a, c) for a, c in taps if 0 <= a < h and 0 <= c < w]
                inv = 1.0 / len(valid)
                for a, c in valid:
                    p[b * h * w + a * w + c, b * h * w + hh * w + ww] += inv
    return jnp.asarray(p)


SHIFT_MATS = _build_shift_matrices(N, H, W)   # (9, M, M)
POOL_MAT = _build_avgpool_matrix(N, H, W)     # (M, M)

# ----------------------------------------------------------------------------
# The single fused Pallas kernel
# ----------------------------------------------------------------------------
def _cell_kernel(x0_ref, x1_ref, wp0_ref, bp0_ref, wp1_ref, bp1_ref,
                 wc3_ref, bc3_ref, wc1a_ref, bc1a_ref, wc1b_ref, bc1b_ref,
                 shift_ref, pool_ref, out_ref):
    def mm(a, b):
        return jnp.dot(a, b, preferred_element_type=jnp.float32)

    # --- preprocess0 / preprocess1: ReLU -> 1x1 conv (BN scale folded) -> bias
    s0 = mm(wp0_ref[...], jnp.maximum(x0_ref[...], 0.0)) + bp0_ref[...]
    s1 = mm(wp1_ref[...], jnp.maximum(x1_ref[...], 0.0)) + bp1_ref[...]

    s0r = jnp.maximum(s0, 0.0)
    s1r = jnp.maximum(s1, 0.0)

    # --- node 2 = nor_conv_3x3(s0) + nor_conv_1x1(s1)
    s2 = mm(wc1a_ref[...], s1r) + bc1a_ref[...] + bc3_ref[...]
    for tap in range(9):                    # static unroll: 9 tap matmuls
        s2 = s2 + mm(mm(wc3_ref[tap], s0r), shift_ref[tap])

    # --- node 3 = skip_connect(s0) + avg_pool_3x3(s2)
    s3 = s0 + mm(s2, pool_ref[...])

    # --- node 4 = nor_conv_1x1(s1) + skip_connect(s3)
    s4 = mm(wc1b_ref[...], s1r) + bc1b_ref[...] + s3

    # --- channel concat of states [2, 3, 4] -> lane-dense (3*C, M) output
    out_ref[0:C, :] = s2
    out_ref[C:2 * C, :] = s3
    out_ref[2 * C:3 * C, :] = s4


# ----------------------------------------------------------------------------
# BN folding helpers (trace-time, outside the kernel)
# ----------------------------------------------------------------------------
def _fold_1x1(p):
    scale = p["scale"].reshape(-1, 1)                       # (Cout, 1)
    return p["w"][:, :, 0, 0] * scale, p["bias"].reshape(-1, 1)


def _fold_3x3(p):
    scale = p["scale"].reshape(-1, 1)
    taps = [p["w"][:, :, di, dj] * scale
            for di in range(3) for dj in range(3)]          # tap = di*3 + dj
    return jnp.stack(taps, axis=0), p["bias"].reshape(-1, 1)


# ----------------------------------------------------------------------------
# Cell forward (one pallas_call)
# ----------------------------------------------------------------------------
@jax.jit
def nasnet_infer_cell(params, s0_nchw, s1_nchw, drop_path_prob=0.0):
    del drop_path_prob        # inference cell: unused, as in the PyTorch forward
    # NCHW -> channel-major flat (C, N*H*W): lane dim = 128 everywhere in-kernel
    x0 = jnp.transpose(s0_nchw, (1, 0, 2, 3)).reshape(C_PREV_PREV, M)
    x1 = jnp.transpose(s1_nchw, (1, 0, 2, 3)).reshape(C_PREV, M)

    wp0, bp0 = _fold_1x1(params["preprocess0"])
    wp1, bp1 = _fold_1x1(params["preprocess1"])
    wc3, bc3 = _fold_3x3(params["edges"]["2<-0"])     # nor_conv_3x3
    wc1a, bc1a = _fold_1x1(params["edges"]["2<-1"])   # nor_conv_1x1
    wc1b, bc1b = _fold_1x1(params["edges"]["4<-1"])   # nor_conv_1x1

    vmem = pl.BlockSpec(memory_space=pltpu.MemorySpace.VMEM)
    out_flat = pl.pallas_call(
        _cell_kernel,
        out_shape=jax.ShapeDtypeStruct((3 * C, M), jnp.float32),
        in_specs=[vmem] * 14,
        out_specs=vmem,
    )(x0, x1, wp0, bp0, wp1, bp1, wc3, bc3, wc1a, bc1a, wc1b, bc1b,
      SHIFT_MATS, POOL_MAT)

    # (3C, M) -> (3C, N, H, W) -> NCHW
    return jnp.transpose(out_flat.reshape(3 * C, N, H, W), (1, 0, 2, 3))


# ----------------------------------------------------------------------------
# Parameter construction (deterministic, synthetic)
# ----------------------------------------------------------------------------
def make_relu_conv_bn_params(key, cin, cout, k):
    kw, kg, kb, km, kv = jax.random.split(key, 5)
    w = 0.1 * jax.random.normal(kw, (cout, cin, k, k), jnp.float32)   # OIHW
    gamma = jax.random.uniform(kg, (cout,), jnp.float32, 0.8, 1.2)
    beta = 0.1 * jax.random.normal(kb, (cout,), jnp.float32)
    r_mean = 0.1 * jax.random.normal(km, (cout,), jnp.float32)
    r_var = jax.random.uniform(kv, (cout,), jnp.float32, 0.5, 1.5)
    scale = gamma / jnp.sqrt(r_var + BN_EPS)
    bias = beta - r_mean * scale
    return {"w": w, "scale": scale.reshape(1, cout), "bias": bias.reshape(1, cout)}


def init_cell_params(key):
    keys = jax.random.split(key, 2 + 16)
    params = {
        "preprocess0": make_relu_conv_bn_params(keys[0], C_PREV_PREV, C, 1),
        "preprocess1": make_relu_conv_bn_params(keys[1], C_PREV, C, 1),
        "edges": {},
    }
    ki = 2
    for i, node in enumerate(GENOTYPE["normal"]):
        for name, j in node:
            node_str = "{:}<-{:}".format(i + 2, j)
            if name == "nor_conv_1x1":
                params["edges"][node_str] = make_relu_conv_bn_params(keys[ki], C, C, 1)
            elif name == "nor_conv_3x3":
                params["edges"][node_str] = make_relu_conv_bn_params(keys[ki], C, C, 3)
            else:
                params["edges"][node_str] = None
            ki += 1
    return params


# ----------------------------------------------------------------------------
# Pure-JAX reference (NCHW, lax.conv) for a numerical cross-check
# ----------------------------------------------------------------------------
def _ref_relu_conv_bn(x, p, k):
    y = jax.nn.relu(x)
    pad = k // 2
    y = lax.conv_general_dilated(
        y, p["w"], (1, 1), [(pad, pad), (pad, pad)],
        dimension_numbers=("NCHW", "OIHW", "NCHW"),
        precision=lax.Precision.HIGHEST)
    return y * p["scale"].reshape(1, -1, 1, 1) + p["bias"].reshape(1, -1, 1, 1)


def _ref_avgpool(x):
    n, c, h, w = x.shape
    xp = jnp.pad(x, ((0, 0), (0, 0), (1, 1), (1, 1)))
    s = sum(xp[:, :, di:di + h, dj:dj + w] for di in range(3) for dj in range(3))
    ones = jnp.pad(jnp.ones((1, 1, h, w), jnp.float32), ((0, 0), (0, 0), (1, 1), (1, 1)))
    cnt = sum(ones[:, :, di:di + h, dj:dj + w] for di in range(3) for dj in range(3))
    return s / cnt


def ref_cell(params, s0, s1):
    s0 = _ref_relu_conv_bn(s0, params["preprocess0"], 1)
    s1 = _ref_relu_conv_bn(s1, params["preprocess1"], 1)
    states = [s0, s1]
    for i, node in enumerate(GENOTYPE["normal"]):
        clist = []
        for name, j in node:
            node_str = "{:}<-{:}".format(i + 2, j)
            p = params["edges"][node_str]
            x = states[j]
            if name == "skip_connect":
                clist.append(x)
            elif name == "avg_pool_3x3":
                clist.append(_ref_avgpool(x))
            elif name == "nor_conv_1x1":
                clist.append(_ref_relu_conv_bn(x, p, 1))
            else:
                clist.append(_ref_relu_conv_bn(x, p, 3))
        states.append(sum(clist))
    return jnp.concatenate([states[x] for x in GENOTYPE["normal_concat"]], axis=1)


# ----------------------------------------------------------------------------
if __name__ == "__main__":
    key = jax.random.PRNGKey(0)
    kp, k0, k1 = jax.random.split(key, 3)
    params = init_cell_params(kp)
    s0 = jax.random.normal(k0, (N, C_PREV_PREV, H, W), jnp.float32)
    s1 = jax.random.normal(k1, (N, C_PREV, H, W), jnp.float32)

    out = jax.block_until_ready(nasnet_infer_cell(params, s0, s1))

    expected_channels = len(GENOTYPE["normal_concat"]) * C
    assert out.shape == (N, expected_channels, H, W), out.shape

    ref = jax.block_until_ready(ref_cell(params, s0, s1))
    if not np.allclose(np.asarray(out), np.asarray(ref), rtol=1e-2, atol=1e-2):
        raise AssertionError("Pallas cell output mismatch vs reference")

    print("KERNEL_OK")
</pallas_src>

<mosaic_0001>
module attributes {stable_mosaic.version = 11 : i64} {
  func.func @_cell_kernel(%arg0: memref<8x128xf32, #tpu.memory_space<vmem>>, %arg1: memref<8x128xf32, #tpu.memory_space<vmem>>, %arg2: memref<8x8xf32, #tpu.memory_space<vmem>>, %arg3: memref<8x1xf32, #tpu.memory_space<vmem>>, %arg4: memref<8x8xf32, #tpu.memory_space<vmem>>, %arg5: memref<8x1xf32, #tpu.memory_space<vmem>>, %arg6: memref<9x8x8xf32, #tpu.memory_space<vmem>>, %arg7: memref<8x1xf32, #tpu.memory_space<vmem>>, %arg8: memref<8x8xf32, #tpu.memory_space<vmem>>, %arg9: memref<8x1xf32, #tpu.memory_space<vmem>>, %arg10: memref<8x8xf32, #tpu.memory_space<vmem>>, %arg11: memref<8x1xf32, #tpu.memory_space<vmem>>, %arg12: memref<9x128x128xf32, #tpu.memory_space<vmem>>, %arg13: memref<128x128xf32, #tpu.memory_space<vmem>>, %arg14: memref<24x128xf32, #tpu.memory_space<vmem>>) attributes {dimension_semantics = [], scalar_prefetch = 0 : i64, scratch_operands = 0 : i64, tpu.core_type = #tpu.core_type<tc>} {
    %c0 = arith.constant 0 : index
    %c0_0 = arith.constant 0 : index
    %0 = vector.load %arg2[%c0, %c0_0] : memref<8x8xf32, #tpu.memory_space<vmem>>, vector<8x8xf32>
    %c0_1 = arith.constant 0 : index
    %c0_2 = arith.constant 0 : index
    %1 = vector.load %arg0[%c0_1, %c0_2] : memref<8x128xf32, #tpu.memory_space<vmem>>, vector<8x128xf32>
    %cst = arith.constant 0.000000e+00 : f32
    %2 = vector.broadcast %cst : f32 to vector<8x128xf32>
    %3 = arith.maximumf %1, %2 : vector<8x128xf32>
    %cst_3 = arith.constant dense<0.000000e+00> : vector<8x128xf32>
    %4 = tpu.matmul %0, %3, %cst_3 {dimension_numbers = #tpu.dot_dimension_numbers<[1], [0], [0], [1], [0, 0, 1, 1], [], []>} : vector<8x8xf32>, vector<8x128xf32>, vector<8x128xf32> -> vector<8x128xf32>
    %c0_4 = arith.constant 0 : index
    %c0_5 = arith.constant 0 : index
    %5 = vector.load %arg3[%c0_4, %c0_5] : memref<8x1xf32, #tpu.memory_space<vmem>>, vector<8x1xf32>
    %6 = vector.broadcast %5 : vector<8x1xf32> to vector<8x128xf32>
    %7 = arith.addf %4, %6 : vector<8x128xf32>
    %c0_6 = arith.constant 0 : index
    %c0_7 = arith.constant 0 : index
    %8 = vector.load %arg4[%c0_6, %c0_7] : memref<8x8xf32, #tpu.memory_space<vmem>>, vector<8x8xf32>
    %c0_8 = arith.constant 0 : index
    %c0_9 = arith.constant 0 : index
    %9 = vector.load %arg1[%c0_8, %c0_9] : memref<8x128xf32, #tpu.memory_space<vmem>>, vector<8x128xf32>
    %cst_10 = arith.constant 0.000000e+00 : f32
    %10 = vector.broadcast %cst_10 : f32 to vector<8x128xf32>
    %11 = arith.maximumf %9, %10 : vector<8x128xf32>
    %cst_11 = arith.constant dense<0.000000e+00> : vector<8x128xf32>
    %12 = tpu.matmul %8, %11, %cst_11 {dimension_numbers = #tpu.dot_dimension_numbers<[1], [0], [0], [1], [0, 0, 1, 1], [], []>} : vector<8x8xf32>, vector<8x128xf32>, vector<8x128xf32> -> vector<8x128xf32>
    %c0_12 = arith.constant 0 : index
    %c0_13 = arith.constant 0 : index
    %13 = vector.load %arg5[%c0_12, %c0_13] : memref<8x1xf32, #tpu.memory_space<vmem>>, vector<8x1xf32>
    %14 = vector.broadcast %13 : vector<8x1xf32> to vector<8x128xf32>
    %15 = arith.addf %12, %14 : vector<8x128xf32>
    %cst_14 = arith.constant 0.000000e+00 : f32
    %16 = vector.broadcast %cst_14 : f32 to vector<8x128xf32>
    %17 = arith.maximumf %7, %16 : vector<8x128xf32>
    %cst_15 = arith.constant 0.000000e+00 : f32
    %18 = vector.broadcast %cst_15 : f32 to vector<8x128xf32>
    %19 = arith.maximumf %15, %18 : vector<8x128xf32>
    %c0_16 = arith.constant 0 : index
    %c0_17 = arith.constant 0 : index
    %20 = vector.load %arg8[%c0_16, %c0_17] : memref<8x8xf32, #tpu.memory_space<vmem>>, vector<8x8xf32>
    %cst_18 = arith.constant dense<0.000000e+00> : vector<8x128xf32>
    %21 = tpu.matmul %20, %19, %cst_18 {dimension_numbers = #tpu.dot_dimension_numbers<[1], [0], [0], [1], [0, 0, 1, 1], [], []>} : vector<8x8xf32>, vector<8x128xf32>, vector<8x128xf32> -> vector<8x128xf32>
    %c0_19 = arith.constant 0 : index
    %c0_20 = arith.constant 0 : index
    %22 = vector.load %arg9[%c0_19, %c0_20] : memref<8x1xf32, #tpu.memory_space<vmem>>, vector<8x1xf32>
    %23 = vector.broadcast %22 : vector<8x1xf32> to vector<8x128xf32>
    %24 = arith.addf %21, %23 : vector<8x128xf32>
    %c0_21 = arith.constant 0 : index
    %c0_22 = arith.constant 0 : index
    %25 = vector.load %arg7[%c0_21, %c0_22] : memref<8x1xf32, #tpu.memory_space<vmem>>, vector<8x1xf32>
    %26 = vector.broadcast %25 : vector<8x1xf32> to vector<8x128xf32>
    %27 = arith.addf %24, %26 : vector<8x128xf32>
    %c0_23 = arith.constant 0 : index
    %c0_24 = arith.constant 0 : index
    %c0_25 = arith.constant 0 : index
    %28 = vector.load %arg6[%c0_23, %c0_24, %c0_25] : memref<9x8x8xf32, #tpu.memory_space<vmem>>, vector<1x8x8xf32>
    %29 = vector.shape_cast %28 : vector<1x8x8xf32> to vector<8x8xf32>
    %cst_26 = arith.constant dense<0.000000e+00> : vector<8x128xf32>
    %30 = tpu.matmul %29, %17, %cst_26 {dimension_numbers = #tpu.dot_dimension_numbers<[1], [0], [0], [1], [0, 0, 1, 1], [], []>} : vector<8x8xf32>, vector<8x128xf32>, vector<8x128xf32> -> vector<8x128xf32>
    %c0_27 = arith.constant 0 : index
    %c0_28 = arith.constant 0 : index
    %c0_29 = arith.constant 0 : index
    %31 = vector.load %arg12[%c0_27, %c0_28, %c0_29] : memref<9x128x128xf32, #tpu.memory_space<vmem>>, vector<1x128x128xf32>
    %32 = vector.shape_cast %31 : vector<1x128x128xf32> to vector<128x128xf32>
    %cst_30 = arith.constant dense<0.000000e+00> : vector<8x128xf32>
    %33 = tpu.matmul %30, %32, %cst_30 {dimension_numbers = #tpu.dot_dimension_numbers<[1], [0], [0], [1], [0, 0, 1, 1], [], []>} : vector<8x128xf32>, vector<128x128xf32>, vector<8x128xf32> -> vector<8x128xf32>
    %34 = arith.addf %27, %33 : vector<8x128xf32>
    %c1 = arith.constant 1 : index
    %c0_31 = arith.constant 0 : index
    %c0_32 = arith.constant 0 : index
    %35 = vector.load %arg6[%c1, %c0_31, %c0_32] : memref<9x8x8xf32, #tpu.memory_space<vmem>>, vector<1x8x8xf32>
    %36 = vector.shape_cast %35 : vector<1x8x8xf32> to vector<8x8xf32>
    %cst_33 = arith.constant dense<0.000000e+00> : vector<8x128xf32>
    %37 = tpu.matmul %36, %17, %cst_33 {dimension_numbers = #tpu.dot_dimension_numbers<[1], [0], [0], [1], [0, 0, 1, 1], [], []>} : vector<8x8xf32>, vector<8x128xf32>, vector<8x128xf32> -> vector<8x128xf32>
    %c1_34 = arith.constant 1 : index
    %c0_35 = arith.constant 0 : index
    %c0_36 = arith.constant 0 : index
    %38 = vector.load %arg12[%c1_34, %c0_35, %c0_36] : memref<9x128x128xf32, #tpu.memory_space<vmem>>, vector<1x128x128xf32>
    %39 = vector.shape_cast %38 : vector<1x128x128xf32> to vector<128x128xf32>
    %cst_37 = arith.constant dense<0.000000e+00> : vector<8x128xf32>
    %40 = tpu.matmul %37, %39, %cst_37 {dimension_numbers = #tpu.dot_dimension_numbers<[1], [0], [0], [1], [0, 0, 1, 1], [], []>} : vector<8x128xf32>, vector<128x128xf32>, vector<8x128xf32> -> vector<8x128xf32>
    %41 = arith.addf %34, %40 : vector<8x128xf32>
    %c2 = arith.constant 2 : index
    %c0_38 = arith.constant 0 : index
    %c0_39 = arith.constant 0 : index
    %42 = vector.load %arg6[%c2, %c0_38, %c0_39] : memref<9x8x8xf32, #tpu.memory_space<vmem>>, vector<1x8x8xf32>
    %43 = vector.shape_cast %42 : vector<1x8x8xf32> to vector<8x8xf32>
    %cst_40 = arith.constant dense<0.000000e+00> : vector<8x128xf32>
    %44 = tpu.matmul %43, %17, %cst_40 {dimension_numbers = #tpu.dot_dimension_numbers<[1], [0], [0], [1], [0, 0, 1, 1], [], []>} : vector<8x8xf32>, vector<8x128xf32>, vector<8x128xf32> -> vector<8x128xf32>
    %c2_41 = arith.constant 2 : index
    %c0_42 = arith.constant 0 : index
    %c0_43 = arith.constant 0 : index
    %45 = vector.load %arg12[%c2_41, %c0_42, %c0_43] : memref<9x128x128xf32, #tpu.memory_space<vmem>>, vector<1x128x128xf32>
    %46 = vector.shape_cast %45 : vector<1x128x128xf32> to vector<128x128xf32>
    %cst_44 = arith.constant dense<0.000000e+00> : vector<8x128xf32>
    %47 = tpu.matmul %44, %46, %cst_44 {dimension_numbers = #tpu.dot_dimension_numbers<[1], [0], [0], [1], [0, 0, 1, 1], [], []>} : vector<8x128xf32>, vector<128x128xf32>, vector<8x128xf32> -> vector<8x128xf32>
    %48 = arith.addf %41, %47 : vector<8x128xf32>
    %c3 = arith.constant 3 : index
    %c0_45 = arith.constant 0 : index
    %c0_46 = arith.constant 0 : index
    %49 = vector.load %arg6[%c3, %c0_45, %c0_46] : memref<9x8x8xf32, #tpu.memory_space<vmem>>, vector<1x8x8xf32>
    %50 = vector.shape_cast %49 : vector<1x8x8xf32> to vector<8x8xf32>
    %cst_47 = arith.constant dense<0.000000e+00> : vector<8x128xf32>
    %51 = tpu.matmul %50, %17, %cst_47 {dimension_numbers = #tpu.dot_dimension_numbers<[1], [0], [0], [1], [0, 0, 1, 1], [], []>} : vector<8x8xf32>, vector<8x128xf32>, vector<8x128xf32> -> vector<8x128xf32>
    %c3_48 = arith.constant 3 : index
    %c0_49 = arith.constant 0 : index
    %c0_50 = arith.constant 0 : index
    %52 = vector.load %arg12[%c3_48, %c0_49, %c0_50] : memref<9x128x128xf32, #tpu.memory_space<vmem>>, vector<1x128x128xf32>
    %53 = vector.shape_cast %52 : vector<1x128x128xf32> to vector<128x128xf32>
    %cst_51 = arith.constant dense<0.000000e+00> : vector<8x128xf32>
    %54 = tpu.matmul %51, %53, %cst_51 {dimension_numbers = #tpu.dot_dimension_numbers<[1], [0], [0], [1], [0, 0, 1, 1], [], []>} : vector<8x128xf32>, vector<128x128xf32>, vector<8x128xf32> -> vector<8x128xf32>
    %55 = arith.addf %48, %54 : vector<8x128xf32>
    %c4 = arith.constant 4 : index
    %c0_52 = arith.constant 0 : index
    %c0_53 = arith.constant 0 : index
    %56 = vector.load %arg6[%c4, %c0_52, %c0_53] : memref<9x8x8xf32, #tpu.memory_space<vmem>>, vector<1x8x8xf32>
    %57 = vector.shape_cast %56 : vector<1x8x8xf32> to vector<8x8xf32>
    %cst_54 = arith.constant dense<0.000000e+00> : vector<8x128xf32>
    %58 = tpu.matmul %57, %17, %cst_54 {dimension_numbers = #tpu.dot_dimension_numbers<[1], [0], [0], [1], [0, 0, 1, 1], [], []>} : vector<8x8xf32>, vector<8x128xf32>, vector<8x128xf32> -> vector<8x128xf32>
    %c4_55 = arith.constant 4 : index
    %c0_56 = arith.constant 0 : index
    %c0_57 = arith.constant 0 : index
    %59 = vector.load %arg12[%c4_55, %c0_56, %c0_57] : memref<9x128x128xf32, #tpu.memory_space<vmem>>, vector<1x128x128xf32>
    %60 = vector.shape_cast %59 : vector<1x128x128xf32> to vector<128x128xf32>
    %cst_58 = arith.constant dense<0.000000e+00> : vector<8x128xf32>
    %61 = tpu.matmul %58, %60, %cst_58 {dimension_numbers = #tpu.dot_dimension_numbers<[1], [0], [0], [1], [0, 0, 1, 1], [], []>} : vector<8x128xf32>, vector<128x128xf32>, vector<8x128xf32> -> vector<8x128xf32>
    %62 = arith.addf %55, %61 : vector<8x128xf32>
    %c5 = arith.constant 5 : index
    %c0_59 = arith.constant 0 : index
    %c0_60 = arith.constant 0 : index
    %63 = vector.load %arg6[%c5, %c0_59, %c0_60] : memref<9x8x8xf32, #tpu.memory_space<vmem>>, vector<1x8x8xf32>
    %64 = vector.shape_cast %63 : vector<1x8x8xf32> to vector<8x8xf32>
    %cst_61 = arith.constant dense<0.000000e+00> : vector<8x128xf32>
    %65 = tpu.matmul %64, %17, %cst_61 {dimension_numbers = #tpu.dot_dimension_numbers<[1], [0], [0], [1], [0, 0, 1, 1], [], []>} : vector<8x8xf32>, vector<8x128xf32>, vector<8x128xf32> -> vector<8x128xf32>
    %c5_62 = arith.constant 5 : index
    %c0_63 = arith.constant 0 : index
    %c0_64 = arith.constant 0 : index
    %66 = vector.load %arg12[%c5_62, %c0_63, %c0_64] : memref<9x128x128xf32, #tpu.memory_space<vmem>>, vector<1x128x128xf32>
    %67 = vector.shape_cast %66 : vector<1x128x128xf32> to vector<128x128xf32>
    %cst_65 = arith.constant dense<0.000000e+00> : vector<8x128xf32>
    %68 = tpu.matmul %65, %67, %cst_65 {dimension_numbers = #tpu.dot_dimension_numbers<[1], [0], [0], [1], [0, 0, 1, 1], [], []>} : vector<8x128xf32>, vector<128x128xf32>, vector<8x128xf32> -> vector<8x128xf32>
    %69 = arith.addf %62, %68 : vector<8x128xf32>
    %c6 = arith.constant 6 : index
    %c0_66 = arith.constant 0 : index
    %c0_67 = arith.constant 0 : index
    %70 = vector.load %arg6[%c6, %c0_66, %c0_67] : memref<9x8x8xf32, #tpu.memory_space<vmem>>, vector<1x8x8xf32>
    %71 = vector.shape_cast %70 : vector<1x8x8xf32> to vector<8x8xf32>
    %cst_68 = arith.constant dense<0.000000e+00> : vector<8x128xf32>
    %72 = tpu.matmul %71, %17, %cst_68 {dimension_numbers = #tpu.dot_dimension_numbers<[1], [0], [0], [1], [0, 0, 1, 1], [], []>} : vector<8x8xf32>, vector<8x128xf32>, vector<8x128xf32> -> vector<8x128xf32>
    %c6_69 = arith.constant 6 : index
    %c0_70 = arith.constant 0 : index
    %c0_71 = arith.constant 0 : index
    %73 = vector.load %arg12[%c6_69, %c0_70, %c0_71] : memref<9x128x128xf32, #tpu.memory_space<vmem>>, vector<1x128x128xf32>
    %74 = vector.shape_cast %73 : vector<1x128x128xf32> to vector<128x128xf32>
    %cst_72 = arith.constant dense<0.000000e+00> : vector<8x128xf32>
    %75 = tpu.matmul %72, %74, %cst_72 {dimension_numbers = #tpu.dot_dimension_numbers<[1], [0], [0], [1], [0, 0, 1, 1], [], []>} : vector<8x128xf32>, vector<128x128xf32>, vector<8x128xf32> -> vector<8x128xf32>
    %76 = arith.addf %69, %75 : vector<8x128xf32>
    %c7 = arith.constant 7 : index
    %c0_73 = arith.constant 0 : index
    %c0_74 = arith.constant 0 : index
    %77 = vector.load %arg6[%c7, %c0_73, %c0_74] : memref<9x8x8xf32, #tpu.memory_space<vmem>>, vector<1x8x8xf32>
    %78 = vector.shape_cast %77 : vector<1x8x8xf32> to vector<8x8xf32>
    %cst_75 = arith.constant dense<0.000000e+00> : vector<8x128xf32>
    %79 = tpu.matmul %78, %17, %cst_75 {dimension_numbers = #tpu.dot_dimension_numbers<[1], [0], [0], [1], [0, 0, 1, 1], [], []>} : vector<8x8xf32>, vector<8x128xf32>, vector<8x128xf32> -> vector<8x128xf32>
    %c7_76 = arith.constant 7 : index
    %c0_77 = arith.constant 0 : index
    %c0_78 = arith.constant 0 : index
    %80 = vector.load %arg12[%c7_76, %c0_77, %c0_78] : memref<9x128x128xf32, #tpu.memory_space<vmem>>, vector<1x128x128xf32>
    %81 = vector.shape_cast %80 : vector<1x128x128xf32> to vector<128x128xf32>
    %cst_79 = arith.constant dense<0.000000e+00> : vector<8x128xf32>
    %82 = tpu.matmul %79, %81, %cst_79 {dimension_numbers = #tpu.dot_dimension_numbers<[1], [0], [0], [1], [0, 0, 1, 1], [], []>} : vector<8x128xf32>, vector<128x128xf32>, vector<8x128xf32> -> vector<8x128xf32>
    %83 = arith.addf %76, %82 : vector<8x128xf32>
    %c8 = arith.constant 8 : index
    %c0_80 = arith.constant 0 : index
    %c0_81 = arith.constant 0 : index
    %84 = vector.load %arg6[%c8, %c0_80, %c0_81] : memref<9x8x8xf32, #tpu.memory_space<vmem>>, vector<1x8x8xf32>
    %85 = vector.shape_cast %84 : vector<1x8x8xf32> to vector<8x8xf32>
    %cst_82 = arith.constant dense<0.000000e+00> : vector<8x128xf32>
    %86 = tpu.matmul %85, %17, %cst_82 {dimension_numbers = #tpu.dot_dimension_numbers<[1], [0], [0], [1], [0, 0, 1, 1], [], []>} : vector<8x8xf32>, vector<8x128xf32>, vector<8x128xf32> -> vector<8x128xf32>
    %c8_83 = arith.constant 8 : index
    %c0_84 = arith.constant 0 : index
    %c0_85 = arith.constant 0 : index
    %87 = vector.load %arg12[%c8_83, %c0_84, %c0_85] : memref<9x128x128xf32, #tpu.memory_space<vmem>>, vector<1x128x128xf32>
    %88 = vector.shape_cast %87 : vector<1x128x128xf32> to vector<128x128xf32>
    %cst_86 = arith.constant dense<0.000000e+00> : vector<8x128xf32>
    %89 = tpu.matmul %86, %88, %cst_86 {dimension_numbers = #tpu.dot_dimension_numbers<[1], [0], [0], [1], [0, 0, 1, 1], [], []>} : vector<8x128xf32>, vector<128x128xf32>, vector<8x128xf32> -> vector<8x128xf32>
    %90 = arith.addf %83, %89 : vector<8x128xf32>
    %c0_87 = arith.constant 0 : index
    %c0_88 = arith.constant 0 : index
    %91 = vector.load %arg13[%c0_87, %c0_88] : memref<128x128xf32, #tpu.memory_space<vmem>>, vector<128x128xf32>
    %cst_89 = arith.constant dense<0.000000e+00> : vector<8x128xf32>
    %92 = tpu.matmul %90, %91, %cst_89 {dimension_numbers = #tpu.dot_dimension_numbers<[1], [0], [0], [1], [0, 0, 1, 1], [], []>} : vector<8x128xf32>, vector<128x128xf32>, vector<8x128xf32> -> vector<8x128xf32>
    %93 = arith.addf %7, %92 : vector<8x128xf32>
    %c0_90 = arith.constant 0 : index
    %c0_91 = arith.constant 0 : index
    %94 = vector.load %arg10[%c0_90, %c0_91] : memref<8x8xf32, #tpu.memory_space<vmem>>, vector<8x8xf32>
    %cst_92 = arith.constant dense<0.000000e+00> : vector<8x128xf32>
    %95 = tpu.matmul %94, %19, %cst_92 {dimension_numbers = #tpu.dot_dimension_numbers<[1], [0], [0], [1], [0, 0, 1, 1], [], []>} : vector<8x8xf32>, vector<8x128xf32>, vector<8x128xf32> -> vector<8x128xf32>
    %c0_93 = arith.constant 0 : index
    %c0_94 = arith.constant 0 : index
    %96 = vector.load %arg11[%c0_93, %c0_94] : memref<8x1xf32, #tpu.memory_space<vmem>>, vector<8x1xf32>
    %97 = vector.broadcast %96 : vector<8x1xf32> to vector<8x128xf32>
    %98 = arith.addf %95, %97 : vector<8x128xf32>
    %99 = arith.addf %98, %93 : vector<8x128xf32>
    %c0_95 = arith.constant 0 : index
    %c0_96 = arith.constant 0 : index
    %100 = vector.load %arg14[%c0_95, %c0_96] : memref<24x128xf32, #tpu.memory_space<vmem>>, vector<8x128xf32>
    tpu.vector_store %arg14[%c0_95, %c0_96], %90 {strides = array<i32>} : memref<24x128xf32, #tpu.memory_space<vmem>>, vector<8x128xf32>,
    %c8_97 = arith.constant 8 : index
    %c0_98 = arith.constant 0 : index
    %101 = vector.load %arg14[%c8_97, %c0_98] : memref<24x128xf32, #tpu.memory_space<vmem>>, vector<8x128xf32>
    tpu.vector_store %arg14[%c8_97, %c0_98], %93 {strides = array<i32>} : memref<24x128xf32, #tpu.memory_space<vmem>>, vector<8x128xf32>,
    %c16 = arith.constant 16 : index
    %c0_99 = arith.constant 0 : index
    %102 = vector.load %arg14[%c16, %c0_99] : memref<24x128xf32, #tpu.memory_space<vmem>>, vector<8x128xf32>
    tpu.vector_store %arg14[%c16, %c0_99], %99 {strides = array<i32>} : memref<24x128xf32, #tpu.memory_space<vmem>>, vector<8x128xf32>,
    return
  }
}

</mosaic_0001>

<bundles_post_ra>
// kernel: nasnet_infer_cell.1
= control target key start
LH: loop header
LB: loop body
LE: loop exit
PB: predicated region body
PF: predicated region fallthrough
CT: control target
= control target key end

     0   :  { %19 = vsyncpa [#allocation3], 0  ;;  %s2618_s29 = smov [#allocation2]   ;;  %s3085_s0 = inlined_call_operand.vmem [shape: f32[8,128], index: 0, kind: input, shape index: {}]   ;;  %s3086_s1 = inlined_call_operand.vmem [shape: f32[8,128], index: 1, kind: input, shape index: {}]   ;;  %s3087_s2 = inlined_call_operand.vmem [shape: f32[8,8], index: 2, kind: input, shape index: {}]   ;;  %s3088_s3 = inlined_call_operand.vmem [shape: f32[8,1], index: 3, kind: input, shape index: {}]   ;;  %s3089_s4 = inlined_call_operand.vmem [shape: f32[8,8], index: 4, kind: input, shape index: {}]   ;;  %s3090_s5 = inlined_call_operand.vmem [shape: f32[8,1], index: 5, kind: input, shape index: {}]   ;;  %s3091_s6 = inlined_call_operand.vmem [shape: f32[9,8,8], index: 6, kind: input, shape index: {}]   ;;  %s3092_s7 = inlined_call_operand.vmem [shape: f32[8,1], index: 7, kind: input, shape index: {}]   ;;  %s3093_s8 = inlined_call_operand.vmem [shape: f32[8,8], index: 8, kind: input, shape index: {}]   ;;  %s3094_s9 = inlined_call_operand.vmem [shape: f32[8,1], index: 9, kind: input, shape index: {}]   ;;  %s3095_s10 = inlined_call_operand.vmem [shape: f32[8,8], index: 10, kind: input, shape index: {}]   ;;  %s3096_s11 = inlined_call_operand.vmem [shape: f32[8,1], index: 11, kind: input, shape index: {}]   ;;  %s3097_s12 = inlined_call_operand.hbm [shape: f32[9,128,128], index: 12, kind: input, shape index: {}]   ;;  %s3098_s13 = inlined_call_operand.vmem [shape: f32[128,128], index: 13, kind: input, shape index: {}]   ;;  %s3099_s14 = inlined_call_operand.vmem [shape: f32[24,128], index: 14, kind: output, shape index: {}]  }
   0x1   :  { %s49_s30 = sshll.u32 %s2618_s29, 4  ;;  %s50_s30 = int_to_ptr.vmem [resolvable:$true] %s49_s30 }
   0x2   :  { %s2604_s15 = scalar_lea.vmem %s50_s30, 18432  ;;  %p2609_p1 = scmp.lt.s32.totalorder %s50_s30, %s50_s30 }
   0x3   :  { %p2605_p0 = scmp.ne.s32.totalorder %s50_s30, %s2604_s15  ;;  %p2610_p2 = scmp.lt.s32.totalorder %s2604_s15, %s2604_s15 }
   0x5   :  { %p2611_p3 = por %p2610_p2, %p2609_p1 }
   0x7   :  { %p2612_p4 = pnand %p2611_p3, %p2605_p0 }
   0x9   :  { %2615 = shalt.err (!%p2612_p4)
}
   0xa   :  { %s2619_s16 = smov 128   ;;  %s2620_s17 = smov 8  }
   0xb   :  { %55 = dma.hbm_to_vmem [thread:$0]  %s3097_s12, 18432, %s50_s30, [#allocation3], %s2619_s16, %s2619_s16, %s2620_s17  }
   0xc   :  { %2616 = dma.done.wait [#allocation3], 18432  }
   0xd   :  { %2617 = vsyncadd [#allocation3], 4294948864  ;;  %v2621_v0 = vmov 0.0   ;;  %vm2622_vm0 = vmmov 0   ;;  %v2623_v1 = vmov 0   ;;  %v62_v2 = vld [vmem:[%s3085_s0] sm:$0xff] }
   0xe   :  { %2173 = vmatprep.subr.mxu0 %v2621_v0  ;;  %2178 = vmatprep.subr.mxu1 %v2621_v0  ;;  %v145_v3 = vld [vmem:[%s3086_s1] sm:$0xff]  ;;  %v63_v4 = vmax.f32 %v62_v2, 0.0  ;;  %vm70_vm1 = vcmask 64512   ;;  %v404_v23 = vld [vmem:[#allocation2 + $0x78] sm:$0xff]  ;;  %v1960_v24 = vld [vmem:[%s3091_s6 + $0x8] sm:$0xff] }
   0xf   :  { %2175 = vmatprep.mubr.msk.f32.mxu0 %vm2622_vm0, %v2621_v0  ;;  %2180 = vmatprep.mubr.msk.f32.mxu1 %vm2622_vm0, %v2621_v0  ;;  %v146_v5 = vmax.f32 %v145_v3, 0.0  ;;  %v61_v6 = vld [vmem:[%s3087_s2] sm:$0xff]  ;;  %v403_v25 = vld [vmem:[#allocation2 + $0x70] sm:$0xff]  ;;  %v567_v26 = vld [vmem:[#allocation2 + $0xf8] sm:$0xff] }
  0x10   :  { %2594 = vset.pattern.permute.xlu0 %v2623_v1  ;;  %2595 = vset.pattern.permute.xlu1 %v2623_v1  ;;  %v144_v7 = vld [vmem:[%s3089_s4] sm:$0xff]  ;;  %v402_v27 = vld [vmem:[#allocation2 + $0x68] sm:$0xff]  ;;  %v566_v28 = vld [vmem:[#allocation2 + $0xf0] sm:$0xff] }
  0x11   :  { %v64_v8 = vld [vmem:[%s3088_s3] sm:$0xff]  ;;  %2174 = vmatpush3.msra.mxu0 %v63_v4  ;;  %2179 = vmatpush3.msra.mxu1 %v146_v5  ;;  %v565_v30 = vld [vmem:[#allocation2 + $0xe8] sm:$0xff]  ;;  %v400_v31 = vld [vmem:[#allocation2 + $0x58] sm:$0xff] }
  0x12   :  { %67 = vperm.xlu0 %2594, %v64_v8   ;;  %v147_v9 = vld [vmem:[%s3090_s5] sm:$0xff]  ;;  %2176 = vmatmul.mubr.msk.f32.vlgmr.msra.gmra.mxu0 %vm70_vm1, %v61_v6  ;;  %v399_v33 = vld [vmem:[#allocation2 + $0x50] sm:$0xff]  ;;  %v563_v34 = vld [vmem:[#allocation2 + $0xd8] sm:$0xff] }
  0x13   :  { %2181 = vmatmul.mubr.msk.f32.vlgmr.msra.gmra.mxu1 %vm70_vm1, %v144_v7  ;;  %2183 = vmatprep.subr.mxu0 %v2621_v0  ;;  %v1868_v10 = vld [vmem:[%s3096_s11] sm:$0xff]  ;;  %v398_v35 = vld [vmem:[#allocation2 + $0x48] sm:$0xff]  ;;  %v562_v36 = vld [vmem:[#allocation2 + $0xd0] sm:$0xff] }
  0x14   :  { %2188 = vmatprep.subr.mxu1 %v2621_v0  ;;  %2190 = vmatprep.mubr.msk.f32.mxu1 %vm2622_vm0, %v2621_v0  ;;  %v315_v21 = vld [vmem:[%s3091_s6] sm:$0xff]  ;;  %v561_v38 = vld [vmem:[#allocation2 + $0xc8] sm:$0xff]  ;;  %v396_v39 = vld [vmem:[#allocation2 + $0x38] sm:$0xff] }
  0x15   :  { %2185 = vmatprep.mubr.msk.f32.mxu0 %vm2622_vm0, %v2621_v0  ;;  %v228_v22 = vld [vmem:[%s3093_s8] sm:$0xff]  ;;  %v395_v41 = vld [vmem:[#allocation2 + $0x30] sm:$0xff]  ;;  %v559_v42 = vld [vmem:[#allocation2 + $0xb8] sm:$0xff] }
  0x16   :  { %150 = vperm.xlu0 %2594, %v147_v9   ;;  %v401_v29 = vld [vmem:[#allocation2 + $0x60] sm:$0xff]  ;;  %v394_v43 = vld [vmem:[#allocation2 + $0x28] sm:$0xff]  ;;  %v558_v44 = vld [vmem:[#allocation2 + $0xb0] sm:$0xff] }
  0x17   :  { %v564_v32 = vld [vmem:[#allocation2 + $0xe0] sm:$0xff]  ;;  %v557_v46 = vld [vmem:[#allocation2 + $0xa8] sm:$0xff]  ;;  %v392_v47 = vld [vmem:[#allocation2 + $0x18] sm:$0xff] }
  0x18   :  { %v397_v37 = vld [vmem:[#allocation2 + $0x40] sm:$0xff]  ;;  %v391_v49 = vld [vmem:[#allocation2 + $0x10] sm:$0xff]  ;;  %v555_v50 = vld [vmem:[#allocation2 + $0x98] sm:$0xff] }
  0x19   :  { %v560_v40 = vld [vmem:[#allocation2 + $0xc0] sm:$0xff]  ;;  %v390_v51 = vld [vmem:[#allocation2 + $0x8] sm:$0xff]  ;;  %v554_v52 = vld [vmem:[#allocation2 + $0x90] sm:$0xff] }
  0x1a   :  { %1871 = vperm.xlu0 %2594, %v1868_v10   ;;  %v393_v45 = vld [vmem:[#allocation2 + $0x20] sm:$0xff]  ;;  %v553_v54 = vld [vmem:[#allocation2 + $0x88] sm:$0xff]  ;;  %v1962_v60 = vld [vmem:[%s3091_s6 + $0x10] sm:$0xff] }
  0x1b   :  { %v556_v48 = vld [vmem:[#allocation2 + $0xa0] sm:$0xff]  ;;  %v730_v1 = vld [vmem:[#allocation2 + $0x178] sm:$0xff]  ;;  %v729_v3 = vld [vmem:[#allocation2 + $0x170] sm:$0xff] }
  0x1c   :  { %v389_v53 = vld [vmem:[#allocation2] sm:$0xff]  ;;  %v1964_v2 = vld [vmem:[%s3091_s6 + $0x18] sm:$0xff]  ;;  %v728_v6 = vld [vmem:[#allocation2 + $0x168] sm:$0xff] }
  0x1d   :  { %v552_v55 = vld [vmem:[#allocation2 + $0x80] sm:$0xff]  ;;  %v893_v5 = vld [vmem:[#allocation2 + $0x1f8] sm:$0xff]  ;;  %v892_v7 = vld [vmem:[#allocation2 + $0x1f0] sm:$0xff] }
  0x1e   :  { %v229_v56 = vld [vmem:[%s3094_s9] sm:$0xff]  ;;  %v891_v9 = vld [vmem:[#allocation2 + $0x1e8] sm:$0xff]  ;;  %v726_v10 = vld [vmem:[#allocation2 + $0x158] sm:$0xff] }
  0x1f   :  { %232 = vperm.xlu1 %2595, %v229_v56   ;;  %v308_v57 = vld [vmem:[%s3092_s7] sm:$0xff] }
  0x20   :  { %v727_v8 = vld [vmem:[#allocation2 + $0x160] sm:$0xff] }
  0x23   :  { %311 = vperm.xlu1 %2595, %v308_v57   ;;  %v1219_v57 = vld [vmem:[#allocation2 + $0x2f8] sm:$0xff] }
  0x8d   :  { %v68_v11 = vpop.permute.xlu0 %67 }
  0x91   :  { %v151_v12 = vpop.permute.xlu0 %150 }
  0xd2   :  { %v140_v14 = vpop.f32.mrf.mxu0 }
  0xd3   :  { %v222_v13 = vpop.f32.mrf.mxu1  ;;  %v2739_v16 = vadd.f32 %v140_v14, %v68_v11  ;;  %v890_v11 = vld [vmem:[#allocation2 + $0x1e0] sm:$0xff]  ;;  %v724_v14 = vld [vmem:[#allocation2 + $0x148] sm:$0xff] }
  0xd4   :  { %v2737_v15 = vadd.f32 %v222_v13, %v151_v12  ;;  %v2177_v17 = vpop.f32.mrf.mxu0  ;;  %v725_v12 = vld [vmem:[#allocation2 + $0x150] sm:$0xff]  ;;  %v889_v13 = vld [vmem:[#allocation2 + $0x1d8] sm:$0xff] }
  0xd5   :  { %v2182_v18 = vpop.f32.mrf.mxu1  ;;  %v2743_v20 = vmax.f32 %v2739_v16, 0.0  ;;  %v888_v17 = vld [vmem:[#allocation2 + $0x1d0] sm:$0xff] }
  0xd6   :  { %v227_v19 = vmax.f32 %v2737_v15, 0.0  ;;  %v723_v18 = vld [vmem:[#allocation2 + $0x140] sm:$0xff] }
  0xd7   :  { %2189 = vmatpush3.msra.mxu1 %v2743_v20  ;;  %v1780_v15 = vld [vmem:[%s3098_s13] sm:$0xff] }
  0xd8   :  { %2184 = vmatpush3.msra.mxu0 %v227_v19  ;;  %2191 = vmatmul.mubr.msk.f32.vlgmr.msra.gmra.mxu1 %vm70_vm1, %v315_v21  ;;  %v887_v21 = vld [vmem:[#allocation2 + $0x1c8] sm:$0xff] }
  0xd9   :  { %2228 = vmatprep.subr.mxu1 %v2621_v0  ;;  %2230 = vmatprep.mubr.msk.f32.mxu1 %vm2622_vm0, %v2621_v0 }
  0xda   :  { %2229 = vmatpush3.msra.mxu1 %v2743_v20  ;;  %2193 = vmatprep.subr.mxu0 %v2621_v0 }
  0xdb   :  { %2186 = vmatmul.mubr.msk.f32.vlgmr.msra.gmra.mxu0 %vm70_vm1, %v228_v22  ;;  %2233 = vmatprep.subr.mxu1 %v2621_v0  ;;  %v722_v22 = vld [vmem:[#allocation2 + $0x138] sm:$0xff] }
  0xdc   :  { %2194 = vmatpush3.msra.mxu0 %v404_v23  ;;  %2231 = vmatmul.mubr.msk.f32.vlgmr.msra.gmra.mxu1 %vm70_vm1, %v1960_v24  ;;  %v886_v23 = vld [vmem:[#allocation2 + $0x1c0] sm:$0xff]  ;;  %v721_v24 = vld [vmem:[#allocation2 + $0x130] sm:$0xff] }
  0xdd   :  { %2195 = vmatprep.subr.mxu0 %v2621_v0  ;;  %2234 = vmatpush3.msra.mxu1 %v567_v26  ;;  %v720_v26 = vld [vmem:[#allocation2 + $0x128] sm:$0xff] }
  0xde   :  { %2196 = vmatpush3.msra.mxu0 %v403_v25  ;;  %2235 = vmatprep.subr.mxu1 %v2621_v0  ;;  %v885_v25 = vld [vmem:[#allocation2 + $0x1b8] sm:$0xff] }
  0xdf   :  { %2197 = vmatprep.subr.mxu0 %v2621_v0  ;;  %2236 = vmatpush3.msra.mxu1 %v566_v28  ;;  %v719_v28 = vld [vmem:[#allocation2 + $0x120] sm:$0xff] }
  0xe0   :  { %2198 = vmatpush3.msra.mxu0 %v402_v27  ;;  %2237 = vmatprep.subr.mxu1 %v2621_v0  ;;  %v884_v27 = vld [vmem:[#allocation2 + $0x1b0] sm:$0xff] }
  0xe1   :  { %2199 = vmatprep.subr.mxu0 %v2621_v0  ;;  %2238 = vmatpush3.msra.mxu1 %v565_v30  ;;  %v718_v30 = vld [vmem:[#allocation2 + $0x118] sm:$0xff] }
  0xe2   :  { %2200 = vmatpush3.msra.mxu0 %v401_v29  ;;  %2239 = vmatprep.subr.mxu1 %v2621_v0  ;;  %v883_v29 = vld [vmem:[#allocation2 + $0x1a8] sm:$0xff] }
  0xe3   :  { %2201 = vmatprep.subr.mxu0 %v2621_v0  ;;  %2240 = vmatpush3.msra.mxu1 %v564_v32  ;;  %v717_v32 = vld [vmem:[#allocation2 + $0x110] sm:$0xff] }
  0xe4   :  { %2202 = vmatpush3.msra.mxu0 %v400_v31  ;;  %2241 = vmatprep.subr.mxu1 %v2621_v0  ;;  %v882_v31 = vld [vmem:[#allocation2 + $0x1a0] sm:$0xff] }
  0xe5   :  { %2203 = vmatprep.subr.mxu0 %v2621_v0  ;;  %2242 = vmatpush3.msra.mxu1 %v563_v34  ;;  %v881_v34 = vld [vmem:[#allocation2 + $0x198] sm:$0xff] }
  0xe6   :  { %2204 = vmatpush3.msra.mxu0 %v399_v33  ;;  %2243 = vmatprep.subr.mxu1 %v2621_v0  ;;  %v716_v33 = vld [vmem:[#allocation2 + $0x108] sm:$0xff] }
  0xe7   :  { %2205 = vmatprep.subr.mxu0 %v2621_v0  ;;  %2244 = vmatpush3.msra.mxu1 %v562_v36  ;;  %v880_v36 = vld [vmem:[#allocation2 + $0x190] sm:$0xff] }
  0xe8   :  { %2206 = vmatpush3.msra.mxu0 %v398_v35  ;;  %2245 = vmatprep.subr.mxu1 %v2621_v0  ;;  %v715_v35 = vld [vmem:[#allocation2 + $0x100] sm:$0xff] }
  0xe9   :  { %2207 = vmatprep.subr.mxu0 %v2621_v0  ;;  %2246 = vmatpush3.msra.mxu1 %v561_v38  ;;  %v878_v38 = vld [vmem:[#allocation2 + $0x180] sm:$0xff] }
  0xea   :  { %2208 = vmatpush3.msra.mxu0 %v397_v37  ;;  %2247 = vmatprep.subr.mxu1 %v2621_v0  ;;  %v879_v37 = vld [vmem:[#allocation2 + $0x188] sm:$0xff] }
  0xeb   :  { %2209 = vmatprep.subr.mxu0 %v2621_v0  ;;  %2248 = vmatpush3.msra.mxu1 %v560_v40 }
  0xec   :  { %2210 = vmatpush3.msra.mxu0 %v396_v39  ;;  %2249 = vmatprep.subr.mxu1 %v2621_v0  ;;  %v233_v39 = vpop.permute.xlu1 %232 }
  0xed   :  { %2211 = vmatprep.subr.mxu0 %v2621_v0  ;;  %2250 = vmatpush3.msra.mxu1 %v559_v42 }
  0xee   :  { %2212 = vmatpush3.msra.mxu0 %v395_v41  ;;  %2251 = vmatprep.subr.mxu1 %v2621_v0 }
  0xef   :  { %2213 = vmatprep.subr.mxu0 %v2621_v0  ;;  %2252 = vmatpush3.msra.mxu1 %v558_v44 }
  0xf0   :  { %2214 = vmatpush3.msra.mxu0 %v394_v43  ;;  %2253 = vmatprep.subr.mxu1 %v2621_v0  ;;  %v312_v41 = vpop.permute.xlu1 %311 }
  0xf1   :  { %2215 = vmatprep.subr.mxu0 %v2621_v0  ;;  %2254 = vmatpush3.msra.mxu1 %v557_v46 }
  0xf2   :  { %2216 = vmatpush3.msra.mxu0 %v393_v45  ;;  %2255 = vmatprep.subr.mxu1 %v2621_v0 }
  0xf3   :  { %2217 = vmatprep.subr.mxu0 %v2621_v0  ;;  %2256 = vmatpush3.msra.mxu1 %v556_v48 }
  0xf4   :  { %2218 = vmatpush3.msra.mxu0 %v392_v47  ;;  %2257 = vmatprep.subr.mxu1 %v2621_v0 }
  0xf5   :  { %2219 = vmatprep.subr.mxu0 %v2621_v0  ;;  %2258 = vmatpush3.msra.mxu1 %v555_v50 }
  0xf6   :  { %2220 = vmatpush3.msra.mxu0 %v391_v49  ;;  %2259 = vmatprep.subr.mxu1 %v2621_v0 }
  0xf7   :  { %2221 = vmatprep.subr.mxu0 %v2621_v0  ;;  %2260 = vmatpush3.msra.mxu1 %v554_v52 }
  0xf8   :  { %2222 = vmatpush3.msra.mxu0 %v390_v51  ;;  %2225 = vmatprep.mubr.msk.f32.mxu0 %vm2622_vm0, %v2621_v0  ;;  %v1966_v51 = vld [vmem:[%s3091_s6 + $0x20] sm:$0xff] }
  0xf9   :  { %2223 = vmatprep.subr.mxu0 %v2621_v0  ;;  %2261 = vmatprep.subr.mxu1 %v2621_v0 }
  0xfa   :  { %2224 = vmatpush3.msra.mxu0 %v389_v53  ;;  %2265 = vmatprep.mubr.msk.f32.mxu1 %vm2622_vm0, %v2621_v0  ;;  %v1056_v53 = vld [vmem:[#allocation2 + $0x278] sm:$0xff] }
  0xfb   :  { %2268 = vmatprep.subr.mxu0 %v2621_v0  ;;  %2262 = vmatpush3.msra.mxu1 %v553_v54  ;;  %v1968_v54 = vld [vmem:[%s3091_s6 + $0x28] sm:$0xff] }
  0xfc   :  { %2263 = vmatprep.subr.mxu1 %v2621_v0 }
  0xfd   :  { %2264 = vmatpush3.msra.mxu1 %v552_v55  ;;  %v1055_v55 = vld [vmem:[#allocation2 + $0x270] sm:$0xff] }
  0xfe   :  { %2308 = vmatprep.subr.mxu1 %v2621_v0 }
 0x198   :  { %v385_v58 = vpop.f32.mrf.mxu1 }
 0x199   :  { %2226 = vmatmul.mubr.f32.vlgmr.msra.gmra.mxu0 %v385_v58  ;;  %v1054_v58 = vld [vmem:[#allocation2 + $0x268] sm:$0xff] }
 0x19a   :  { %2269 = vmatpush3.msra.mxu0 %v2743_v20  ;;  %v2192_v59 = vpop.f32.mrf.mxu1  ;;  %2270 = vmatprep.mubr.msk.f32.mxu0 %vm2622_vm0, %v2621_v0 }
 0x19b   :  { %v2814_v61 = vpop.f32.mrf.mxu0  ;;  %2273 = vmatprep.subr.mxu0 %v2621_v0  ;;  %v1218_v59 = vld [vmem:[#allocation2 + $0x2f0] sm:$0xff] }
 0x19c   :  { %v547_v62 = vpop.f32.mrf.mxu1  ;;  %v305_v40 = vadd.f32 %v2814_v61, %v233_v39  ;;  %v1217_v61 = vld [vmem:[#allocation2 + $0x2e8] sm:$0xff]  ;;  %v1972_v39 = vld [vmem:[%s3091_s6 + $0x38] sm:$0xff] }
 0x19d   :  { %v2187_v63 = vpop.f32.mrf.mxu0  ;;  %2266 = vmatmul.mubr.f32.vlgmr.msra.gmra.mxu1 %v547_v62  ;;  %2271 = vmatmul.mubr.msk.f32.vlgmr.msra.gmra.mxu0 %vm70_vm1, %v1962_v60  ;;  %v1053_v60 = vld [vmem:[#allocation2 + $0x260] sm:$0xff]  ;;  %v1052_v62 = vld [vmem:[#allocation2 + $0x258] sm:$0xff] }
 0x19e   :  { %2309 = vmatpush3.msra.mxu1 %v2743_v20  ;;  %2310 = vmatprep.mubr.msk.f32.mxu1 %vm2622_vm0, %v2621_v0  ;;  %v2232_v4 = vpop.f32.mrf.mxu1  ;;  %v314_v42 = vadd.f32 %v312_v41, %v305_v40  ;;  %v1216_v63 = vld [vmem:[#allocation2 + $0x2e0] sm:$0xff]  ;;  %v1381_v40 = vld [vmem:[#allocation2 + $0x370] sm:$0xff] }
 0x19f   :  { %2274 = vmatpush3.msra.mxu0 %v730_v1  ;;  %2313 = vmatprep.subr.mxu1 %v2621_v0  ;;  %v1051_v1 = vld [vmem:[#allocation2 + $0x250] sm:$0xff] }
 0x1a0   :  { %2275 = vmatprep.subr.mxu0 %v2621_v0  ;;  %2305 = vmatprep.mubr.msk.f32.mxu0 %vm2622_vm0, %v2621_v0  ;;  %v1214_v4 = vld [vmem:[#allocation2 + $0x2d0] sm:$0xff] }
 0x1a1   :  { %2311 = vmatmul.mubr.msk.f32.vlgmr.msra.gmra.mxu1 %vm70_vm1, %v1964_v2  ;;  %2276 = vmatpush3.msra.mxu0 %v729_v3  ;;  %v1215_v2 = vld [vmem:[#allocation2 + $0x2d8] sm:$0xff]  ;;  %v1050_v3 = vld [vmem:[#allocation2 + $0x248] sm:$0xff] }
 0x1a2   :  { %2277 = vmatprep.subr.mxu0 %v2621_v0  ;;  %2314 = vmatpush3.msra.mxu1 %v893_v5  ;;  %v1049_v5 = vld [vmem:[#allocation2 + $0x240] sm:$0xff] }
 0x1a3   :  { %2278 = vmatpush3.msra.mxu0 %v728_v6  ;;  %2315 = vmatprep.subr.mxu1 %v2621_v0  ;;  %v1213_v6 = vld [vmem:[#allocation2 + $0x2c8] sm:$0xff] }
 0x1a4   :  { %2279 = vmatprep.subr.mxu0 %v2621_v0  ;;  %2316 = vmatpush3.msra.mxu1 %v892_v7  ;;  %v1048_v7 = vld [vmem:[#allocation2 + $0x238] sm:$0xff] }
 0x1a5   :  { %2280 = vmatpush3.msra.mxu0 %v727_v8  ;;  %2317 = vmatprep.subr.mxu1 %v2621_v0  ;;  %v1212_v8 = vld [vmem:[#allocation2 + $0x2c0] sm:$0xff] }
 0x1a6   :  { %2281 = vmatprep.subr.mxu0 %v2621_v0  ;;  %2318 = vmatpush3.msra.mxu1 %v891_v9  ;;  %v1047_v9 = vld [vmem:[#allocation2 + $0x230] sm:$0xff] }
 0x1a7   :  { %2282 = vmatpush3.msra.mxu0 %v726_v10  ;;  %2319 = vmatprep.subr.mxu1 %v2621_v0  ;;  %v1211_v10 = vld [vmem:[#allocation2 + $0x2b8] sm:$0xff] }
 0x1a8   :  { %2283 = vmatprep.subr.mxu0 %v2621_v0  ;;  %2320 = vmatpush3.msra.mxu1 %v890_v11  ;;  %v1046_v11 = vld [vmem:[#allocation2 + $0x228] sm:$0xff] }
 0x1a9   :  { %2284 = vmatpush3.msra.mxu0 %v725_v12  ;;  %2321 = vmatprep.subr.mxu1 %v2621_v0  ;;  %v1210_v12 = vld [vmem:[#allocation2 + $0x2b0] sm:$0xff] }
 0x1aa   :  { %2285 = vmatprep.subr.mxu0 %v2621_v0  ;;  %2322 = vmatpush3.msra.mxu1 %v889_v13  ;;  %v1045_v13 = vld [vmem:[#allocation2 + $0x220] sm:$0xff] }
 0x1ab   :  { %2286 = vmatpush3.msra.mxu0 %v724_v14  ;;  %2323 = vmatprep.subr.mxu1 %v2621_v0  ;;  %v1209_v14 = vld [vmem:[#allocation2 + $0x2a8] sm:$0xff] }
 0x1ac   :  { %2287 = vmatprep.subr.mxu0 %v2621_v0  ;;  %2324 = vmatpush3.msra.mxu1 %v888_v17  ;;  %v1044_v17 = vld [vmem:[#allocation2 + $0x218] sm:$0xff] }
 0x1ad   :  { %2288 = vmatpush3.msra.mxu0 %v723_v18  ;;  %2325 = vmatprep.subr.mxu1 %v2621_v0  ;;  %v1208_v18 = vld [vmem:[#allocation2 + $0x2a0] sm:$0xff] }
 0x1ae   :  { %2289 = vmatprep.subr.mxu0 %v2621_v0  ;;  %2326 = vmatpush3.msra.mxu1 %v887_v21  ;;  %v1043_v21 = vld [vmem:[#allocation2 + $0x210] sm:$0xff] }
 0x1af   :  { %2290 = vmatpush3.msra.mxu0 %v722_v22  ;;  %2327 = vmatprep.subr.mxu1 %v2621_v0  ;;  %v1042_v22 = vld [vmem:[#allocation2 + $0x208] sm:$0xff] }
 0x1b0   :  { %2291 = vmatprep.subr.mxu0 %v2621_v0  ;;  %2328 = vmatpush3.msra.mxu1 %v886_v23  ;;  %v1207_v23 = vld [vmem:[#allocation2 + $0x298] sm:$0xff] }
 0x1b1   :  { %2292 = vmatpush3.msra.mxu0 %v721_v24  ;;  %2329 = vmatprep.subr.mxu1 %v2621_v0  ;;  %v1041_v24 = vld [vmem:[#allocation2 + $0x200] sm:$0xff] }
 0x1b2   :  { %2293 = vmatprep.subr.mxu0 %v2621_v0  ;;  %2330 = vmatpush3.msra.mxu1 %v885_v25  ;;  %v1206_v25 = vld [vmem:[#allocation2 + $0x290] sm:$0xff] }
 0x1b3   :  { %2294 = vmatpush3.msra.mxu0 %v720_v26  ;;  %2331 = vmatprep.subr.mxu1 %v2621_v0  ;;  %v1205_v26 = vld [vmem:[#allocation2 + $0x288] sm:$0xff] }
 0x1b4   :  { %2295 = vmatprep.subr.mxu0 %v2621_v0  ;;  %2332 = vmatpush3.msra.mxu1 %v884_v27  ;;  %v1204_v27 = vld [vmem:[#allocation2 + $0x280] sm:$0xff] }
 0x1b5   :  { %2296 = vmatpush3.msra.mxu0 %v719_v28  ;;  %2333 = vmatprep.subr.mxu1 %v2621_v0 }
 0x1b6   :  { %2297 = vmatprep.subr.mxu0 %v2621_v0  ;;  %2334 = vmatpush3.msra.mxu1 %v883_v29 }
 0x1b7   :  { %2298 = vmatpush3.msra.mxu0 %v718_v30  ;;  %2335 = vmatprep.subr.mxu1 %v2621_v0 }
 0x1b8   :  { %2299 = vmatprep.subr.mxu0 %v2621_v0  ;;  %2336 = vmatpush3.msra.mxu1 %v882_v31 }
 0x1b9   :  { %2300 = vmatpush3.msra.mxu0 %v717_v32  ;;  %2337 = vmatprep.subr.mxu1 %v2621_v0 }
 0x1ba   :  { %2301 = vmatprep.subr.mxu0 %v2621_v0  ;;  %2345 = vmatprep.mubr.msk.f32.mxu1 %vm2622_vm0, %v2621_v0 }
 0x1bb   :  { %2302 = vmatpush3.msra.mxu0 %v716_v33  ;;  %2338 = vmatpush3.msra.mxu1 %v881_v34 }
 0x1bc   :  { %2303 = vmatprep.subr.mxu0 %v2621_v0  ;;  %2339 = vmatprep.subr.mxu1 %v2621_v0 }
 0x1bd   :  { %2304 = vmatpush3.msra.mxu0 %v715_v35  ;;  %2340 = vmatpush3.msra.mxu1 %v880_v36  ;;  %v1970_v36 = vld [vmem:[%s3091_s6 + $0x30] sm:$0xff] }
 0x1be   :  { %2341 = vmatprep.subr.mxu1 %v2621_v0  ;;  %2348 = vmatprep.subr.mxu0 %v2621_v0 }
 0x1bf   :  { %2342 = vmatpush3.msra.mxu1 %v879_v37 }
 0x1c0   :  { %2343 = vmatprep.subr.mxu1 %v2621_v0 }
 0x1c1   :  { %2344 = vmatpush3.msra.mxu1 %v878_v38  ;;  %v1382_v38 = vld [vmem:[#allocation2 + $0x378] sm:$0xff] }
 0x1c2   :  { %2388 = vmatprep.subr.mxu1 %v2621_v0 }
 0x259   :  { %v471_v43 = vpop.f32.mrf.mxu0 }
 0x25a   :  { %v475_v44 = vadd.f32 %v471_v43, %v314_v42  ;;  %v1545_v42 = vld [vmem:[#allocation2 + $0x3f8] sm:$0xff]  ;;  %v1380_v43 = vld [vmem:[#allocation2 + $0x368] sm:$0xff] }
 0x25b   :  { %v2227_v45 = vpop.f32.mrf.mxu0 }
 0x25c   :  { %v1379_v45 = vld [vmem:[#allocation2 + $0x360] sm:$0xff] }
 0x25d   :  { %v634_v46 = vpop.f32.mrf.mxu1  ;;  %v710_v47 = vpop.f32.mrf.mxu0 }
 0x25e   :  { %v2863_v48 = vadd.f32 %v634_v46, %v475_v44  ;;  %2306 = vmatmul.mubr.f32.vlgmr.msra.gmra.mxu0 %v710_v47  ;;  %v1544_v44 = vld [vmem:[#allocation2 + $0x3f0] sm:$0xff]  ;;  %v1543_v46 = vld [vmem:[#allocation2 + $0x3e8] sm:$0xff]  ;;  %v1378_v47 = vld [vmem:[#allocation2 + $0x358] sm:$0xff] }
 0x25f   :  { %2349 = vmatpush3.msra.mxu0 %v2743_v20  ;;  %v2267_v49 = vpop.f32.mrf.mxu1  ;;  %v2272_v50 = vpop.f32.mrf.mxu0  ;;  %2350 = vmatprep.mubr.msk.f32.mxu0 %vm2622_vm0, %v2621_v0 }
 0x260   :  { %2353 = vmatprep.subr.mxu0 %v2621_v0  ;;  %v1377_v49 = vld [vmem:[#allocation2 + $0x350] sm:$0xff]  ;;  %v1541_v50 = vld [vmem:[#allocation2 + $0x3d8] sm:$0xff] }
 0x261   :  { %v873_v52 = vpop.f32.mrf.mxu1 }
 0x262   :  { %2346 = vmatmul.mubr.f32.vlgmr.msra.gmra.mxu1 %v873_v52  ;;  %2351 = vmatmul.mubr.msk.f32.vlgmr.msra.gmra.mxu0 %vm70_vm1, %v1966_v51  ;;  %v1376_v51 = vld [vmem:[#allocation2 + $0x348] sm:$0xff]  ;;  %v1540_v52 = vld [vmem:[#allocation2 + $0x3d0] sm:$0xff] }
 0x263   :  { %2389 = vmatpush3.msra.mxu1 %v2743_v20  ;;  %2390 = vmatprep.mubr.msk.f32.mxu1 %vm2622_vm0, %v2621_v0  ;;  %v2312_v56 = vpop.f32.mrf.mxu1 }
 0x264   :  { %2354 = vmatpush3.msra.mxu0 %v1056_v53  ;;  %2393 = vmatprep.subr.mxu1 %v2621_v0  ;;  %v1375_v53 = vld [vmem:[#allocation2 + $0x340] sm:$0xff] }
 0x265   :  { %2355 = vmatprep.subr.mxu0 %v2621_v0  ;;  %2385 = vmatprep.mubr.msk.f32.mxu0 %vm2622_vm0, %v2621_v0  ;;  %v1538_v56 = vld [vmem:[#allocation2 + $0x3c0] sm:$0xff] }
 0x266   :  { %2391 = vmatmul.mubr.msk.f32.vlgmr.msra.gmra.mxu1 %vm70_vm1, %v1968_v54  ;;  %2356 = vmatpush3.msra.mxu0 %v1055_v55  ;;  %v1539_v54 = vld [vmem:[#allocation2 + $0x3c8] sm:$0xff]  ;;  %v1374_v55 = vld [vmem:[#allocation2 + $0x338] sm:$0xff] }
 0x267   :  { %2357 = vmatprep.subr.mxu0 %v2621_v0  ;;  %2394 = vmatpush3.msra.mxu1 %v1219_v57  ;;  %v1373_v57 = vld [vmem:[#allocation2 + $0x330] sm:$0xff] }
 0x268   :  { %2358 = vmatpush3.msra.mxu0 %v1054_v58  ;;  %2395 = vmatprep.subr.mxu1 %v2621_v0  ;;  %v1537_v58 = vld [vmem:[#allocation2 + $0x3b8] sm:$0xff] }
 0x269   :  { %2359 = vmatprep.subr.mxu0 %v2621_v0  ;;  %2396 = vmatpush3.msra.mxu1 %v1218_v59  ;;  %v1372_v59 = vld [vmem:[#allocation2 + $0x328] sm:$0xff] }
 0x26a   :  { %2360 = vmatpush3.msra.mxu0 %v1053_v60  ;;  %2397 = vmatprep.subr.mxu1 %v2621_v0  ;;  %v1536_v60 = vld [vmem:[#allocation2 + $0x3b0] sm:$0xff] }
 0x26b   :  { %2361 = vmatprep.subr.mxu0 %v2621_v0  ;;  %2398 = vmatpush3.msra.mxu1 %v1217_v61  ;;  %v1371_v61 = vld [vmem:[#allocation2 + $0x320] sm:$0xff] }
 0x26c   :  { %2362 = vmatpush3.msra.mxu0 %v1052_v62  ;;  %2399 = vmatprep.subr.mxu1 %v2621_v0  ;;  %v1535_v62 = vld [vmem:[#allocation2 + $0x3a8] sm:$0xff] }
 0x26d   :  { %2363 = vmatprep.subr.mxu0 %v2621_v0  ;;  %2400 = vmatpush3.msra.mxu1 %v1216_v63  ;;  %v1370_v63 = vld [vmem:[#allocation2 + $0x318] sm:$0xff] }
 0x26e   :  { %2364 = vmatpush3.msra.mxu0 %v1051_v1  ;;  %2401 = vmatprep.subr.mxu1 %v2621_v0  ;;  %v1369_v1 = vld [vmem:[#allocation2 + $0x310] sm:$0xff] }
 0x26f   :  { %2365 = vmatprep.subr.mxu0 %v2621_v0  ;;  %2402 = vmatpush3.msra.mxu1 %v1215_v2  ;;  %v1534_v2 = vld [vmem:[#allocation2 + $0x3a0] sm:$0xff] }
 0x270   :  { %2366 = vmatpush3.msra.mxu0 %v1050_v3  ;;  %2403 = vmatprep.subr.mxu1 %v2621_v0  ;;  %v1368_v3 = vld [vmem:[#allocation2 + $0x308] sm:$0xff] }
 0x271   :  { %2367 = vmatprep.subr.mxu0 %v2621_v0  ;;  %2404 = vmatpush3.msra.mxu1 %v1214_v4  ;;  %v1533_v4 = vld [vmem:[#allocation2 + $0x398] sm:$0xff] }
 0x272   :  { %2368 = vmatpush3.msra.mxu0 %v1049_v5  ;;  %2405 = vmatprep.subr.mxu1 %v2621_v0  ;;  %v1367_v5 = vld [vmem:[#allocation2 + $0x300] sm:$0xff] }
 0x273   :  { %2369 = vmatprep.subr.mxu0 %v2621_v0  ;;  %2406 = vmatpush3.msra.mxu1 %v1213_v6  ;;  %v1532_v6 = vld [vmem:[#allocation2 + $0x390] sm:$0xff] }
 0x274   :  { %2370 = vmatpush3.msra.mxu0 %v1048_v7  ;;  %2407 = vmatprep.subr.mxu1 %v2621_v0  ;;  %v1531_v7 = vld [vmem:[#allocation2 + $0x388] sm:$0xff] }
 0x275   :  { %2371 = vmatprep.subr.mxu0 %v2621_v0  ;;  %2408 = vmatpush3.msra.mxu1 %v1212_v8  ;;  %v1530_v8 = vld [vmem:[#allocation2 + $0x380] sm:$0xff] }
 0x276   :  { %2372 = vmatpush3.msra.mxu0 %v1047_v9  ;;  %2409 = vmatprep.subr.mxu1 %v2621_v0 }
 0x277   :  { %2373 = vmatprep.subr.mxu0 %v2621_v0  ;;  %2410 = vmatpush3.msra.mxu1 %v1211_v10 }
 0x278   :  { %2374 = vmatpush3.msra.mxu0 %v1046_v11  ;;  %2411 = vmatprep.subr.mxu1 %v2621_v0 }
 0x279   :  { %2375 = vmatprep.subr.mxu0 %v2621_v0  ;;  %2412 = vmatpush3.msra.mxu1 %v1210_v12 }
 0x27a   :  { %2376 = vmatpush3.msra.mxu0 %v1045_v13  ;;  %2413 = vmatprep.subr.mxu1 %v2621_v0 }
 0x27b   :  { %2377 = vmatprep.subr.mxu0 %v2621_v0  ;;  %2414 = vmatpush3.msra.mxu1 %v1209_v14 }
 0x27c   :  { %2378 = vmatpush3.msra.mxu0 %v1044_v17  ;;  %2415 = vmatprep.subr.mxu1 %v2621_v0 }
 0x27d   :  { %2379 = vmatprep.subr.mxu0 %v2621_v0  ;;  %2416 = vmatpush3.msra.mxu1 %v1208_v18 }
 0x27e   :  { %2380 = vmatpush3.msra.mxu0 %v1043_v21  ;;  %2417 = vmatprep.subr.mxu1 %v2621_v0  ;;  %v1974_v21 = vld [vmem:[%s3091_s6 + $0x40] sm:$0xff] }
 0x27f   :  { %2381 = vmatprep.subr.mxu0 %v2621_v0  ;;  %2425 = vmatprep.mubr.msk.f32.mxu1 %vm2622_vm0, %v2621_v0 }
 0x280   :  { %2382 = vmatpush3.msra.mxu0 %v1042_v22  ;;  %2418 = vmatpush3.msra.mxu1 %v1207_v23  ;;  %v1708_v22 = vld [vmem:[#allocation2 + $0x478] sm:$0xff] }
 0x281   :  { %2383 = vmatprep.subr.mxu0 %v2621_v0  ;;  %2419 = vmatprep.subr.mxu1 %v2621_v0 }
 0x282   :  { %2384 = vmatpush3.msra.mxu0 %v1041_v24  ;;  %2420 = vmatpush3.msra.mxu1 %v1206_v25  ;;  %v1707_v24 = vld [vmem:[#allocation2 + $0x470] sm:$0xff] }
 0x283   :  { %2421 = vmatprep.subr.mxu1 %v2621_v0  ;;  %2428 = vmatprep.subr.mxu0 %v2621_v0 }
 0x284   :  { %2422 = vmatpush3.msra.mxu1 %v1205_v26  ;;  %v1705_v26 = vld [vmem:[#allocation2 + $0x460] sm:$0xff] }
 0x285   :  { %2423 = vmatprep.subr.mxu1 %v2621_v0 }
 0x286   :  { %2424 = vmatpush3.msra.mxu1 %v1204_v27  ;;  %v1704_v27 = vld [vmem:[#allocation2 + $0x458] sm:$0xff] }
 0x287   :  { %2468 = vmatprep.subr.mxu1 %v2621_v0 }
 0x31e   :  { %v797_v28 = vpop.f32.mrf.mxu0 }
 0x31f   :  { %v801_v29 = vadd.f32 %v797_v28, %v2863_v48  ;;  %v1542_v48 = vld [vmem:[#allocation2 + $0x3e0] sm:$0xff]  ;;  %v1703_v28 = vld [vmem:[#allocation2 + $0x450] sm:$0xff] }
 0x320   :  { %v2307_v30 = vpop.f32.mrf.mxu0 }
 0x321   :  { %v1701_v30 = vld [vmem:[#allocation2 + $0x440] sm:$0xff] }
 0x322   :  { %v960_v31 = vpop.f32.mrf.mxu1  ;;  %v1036_v32 = vpop.f32.mrf.mxu0 }
 0x323   :  { %v2918_v33 = vadd.f32 %v960_v31, %v801_v29  ;;  %2386 = vmatmul.mubr.f32.vlgmr.msra.gmra.mxu0 %v1036_v32  ;;  %v1702_v29 = vld [vmem:[#allocation2 + $0x448] sm:$0xff]  ;;  %v1700_v31 = vld [vmem:[#allocation2 + $0x438] sm:$0xff]  ;;  %v1699_v32 = vld [vmem:[#allocation2 + $0x430] sm:$0xff] }
 0x324   :  { %2429 = vmatpush3.msra.mxu0 %v2743_v20  ;;  %v2347_v34 = vpop.f32.mrf.mxu1  ;;  %v2352_v35 = vpop.f32.mrf.mxu0  ;;  %2430 = vmatprep.mubr.msk.f32.mxu0 %vm2622_vm0, %v2621_v0 }
 0x325   :  { %2433 = vmatprep.subr.mxu0 %v2621_v0  ;;  %v1697_v34 = vld [vmem:[#allocation2 + $0x420] sm:$0xff]  ;;  %v1696_v35 = vld [vmem:[#allocation2 + $0x418] sm:$0xff] }
 0x326   :  { %v1199_v37 = vpop.f32.mrf.mxu1 }
 0x327   :  { %2426 = vmatmul.mubr.f32.vlgmr.msra.gmra.mxu1 %v1199_v37  ;;  %2431 = vmatmul.mubr.msk.f32.vlgmr.msra.gmra.mxu0 %vm70_vm1, %v1970_v36  ;;  %v1695_v36 = vld [vmem:[#allocation2 + $0x410] sm:$0xff]  ;;  %v1694_v37 = vld [vmem:[#allocation2 + $0x408] sm:$0xff] }
 0x328   :  { %2469 = vmatpush3.msra.mxu1 %v2743_v20  ;;  %2470 = vmatprep.mubr.msk.f32.mxu1 %vm2622_vm0, %v2621_v0  ;;  %v2392_v41 = vpop.f32.mrf.mxu1 }
 0x329   :  { %2434 = vmatpush3.msra.mxu0 %v1382_v38  ;;  %2473 = vmatprep.subr.mxu1 %v2621_v0  ;;  %v1693_v38 = vld [vmem:[#allocation2 + $0x400] sm:$0xff]  ;;  %v1793_v41 = vld [vmem:[%s3098_s13 + $0x68] sm:$0xff] }
 0x32a   :  { %2435 = vmatprep.subr.mxu0 %v2621_v0  ;;  %2465 = vmatprep.mubr.msk.f32.mxu0 %vm2622_vm0, %v2621_v0 }
 0x32b   :  { %2471 = vmatmul.mubr.msk.f32.vlgmr.msra.gmra.mxu1 %vm70_vm1, %v1972_v39  ;;  %2436 = vmatpush3.msra.mxu0 %v1381_v40  ;;  %v1795_v39 = vld [vmem:[%s3098_s13 + $0x78] sm:$0xff]  ;;  %v1794_v40 = vld [vmem:[%s3098_s13 + $0x70] sm:$0xff] }
 0x32c   :  { %2437 = vmatprep.subr.mxu0 %v2621_v0  ;;  %2474 = vmatpush3.msra.mxu1 %v1545_v42  ;;  %v1792_v42 = vld [vmem:[%s3098_s13 + $0x60] sm:$0xff] }
 0x32d   :  { %2438 = vmatpush3.msra.mxu0 %v1380_v43  ;;  %2475 = vmatprep.subr.mxu1 %v2621_v0  ;;  %v1791_v43 = vld [vmem:[%s3098_s13 + $0x58] sm:$0xff] }
 0x32e   :  { %2439 = vmatprep.subr.mxu0 %v2621_v0  ;;  %2476 = vmatpush3.msra.mxu1 %v1544_v44  ;;  %v1790_v44 = vld [vmem:[%s3098_s13 + $0x50] sm:$0xff] }
 0x32f   :  { %2440 = vmatpush3.msra.mxu0 %v1379_v45  ;;  %2477 = vmatprep.subr.mxu1 %v2621_v0  ;;  %v1789_v45 = vld [vmem:[%s3098_s13 + $0x48] sm:$0xff] }
 0x330   :  { %2441 = vmatprep.subr.mxu0 %v2621_v0  ;;  %2478 = vmatpush3.msra.mxu1 %v1543_v46  ;;  %v1788_v46 = vld [vmem:[%s3098_s13 + $0x40] sm:$0xff] }
 0x331   :  { %2442 = vmatpush3.msra.mxu0 %v1378_v47  ;;  %2479 = vmatprep.subr.mxu1 %v2621_v0  ;;  %v1787_v47 = vld [vmem:[%s3098_s13 + $0x38] sm:$0xff] }
 0x332   :  { %2443 = vmatprep.subr.mxu0 %v2621_v0  ;;  %2480 = vmatpush3.msra.mxu1 %v1542_v48  ;;  %v1786_v48 = vld [vmem:[%s3098_s13 + $0x30] sm:$0xff] }
 0x333   :  { %2444 = vmatpush3.msra.mxu0 %v1377_v49  ;;  %2481 = vmatprep.subr.mxu1 %v2621_v0  ;;  %v1785_v49 = vld [vmem:[%s3098_s13 + $0x28] sm:$0xff] }
 0x334   :  { %2445 = vmatprep.subr.mxu0 %v2621_v0  ;;  %2482 = vmatpush3.msra.mxu1 %v1541_v50  ;;  %v1784_v50 = vld [vmem:[%s3098_s13 + $0x20] sm:$0xff] }
 0x335   :  { %2446 = vmatpush3.msra.mxu0 %v1376_v51  ;;  %2483 = vmatprep.subr.mxu1 %v2621_v0  ;;  %v1783_v51 = vld [vmem:[%s3098_s13 + $0x18] sm:$0xff] }
 0x336   :  { %2447 = vmatprep.subr.mxu0 %v2621_v0  ;;  %2484 = vmatpush3.msra.mxu1 %v1540_v52  ;;  %v1782_v52 = vld [vmem:[%s3098_s13 + $0x10] sm:$0xff] }
 0x337   :  { %2448 = vmatpush3.msra.mxu0 %v1375_v53  ;;  %2485 = vmatprep.subr.mxu1 %v2621_v0 }
 0x338   :  { %2449 = vmatprep.subr.mxu0 %v2621_v0  ;;  %2486 = vmatpush3.msra.mxu1 %v1539_v54 }
 0x339   :  { %2450 = vmatpush3.msra.mxu0 %v1374_v55  ;;  %2487 = vmatprep.subr.mxu1 %v2621_v0 }
 0x33a   :  { %2451 = vmatprep.subr.mxu0 %v2621_v0  ;;  %2488 = vmatpush3.msra.mxu1 %v1538_v56 }
 0x33b   :  { %2452 = vmatpush3.msra.mxu0 %v1373_v57  ;;  %2489 = vmatprep.subr.mxu1 %v2621_v0 }
 0x33c   :  { %2453 = vmatprep.subr.mxu0 %v2621_v0  ;;  %2490 = vmatpush3.msra.mxu1 %v1537_v58 }
 0x33d   :  { %2454 = vmatpush3.msra.mxu0 %v1372_v59  ;;  %2491 = vmatprep.subr.mxu1 %v2621_v0 }
 0x33e   :  { %2455 = vmatprep.subr.mxu0 %v2621_v0  ;;  %2492 = vmatpush3.msra.mxu1 %v1536_v60  ;;  %v1867_v60 = vld [vmem:[%s3095_s10] sm:$0xff] }
 0x33f   :  { %2456 = vmatpush3.msra.mxu0 %v1371_v61  ;;  %2493 = vmatprep.subr.mxu1 %v2621_v0 }
 0x340   :  { %2457 = vmatprep.subr.mxu0 %v2621_v0  ;;  %2494 = vmatpush3.msra.mxu1 %v1535_v62  ;;  %v1781_v62 = vld [vmem:[%s3098_s13 + $0x8] sm:$0xff] }
 0x341   :  { %2458 = vmatpush3.msra.mxu0 %v1370_v63  ;;  %2495 = vmatprep.subr.mxu1 %v2621_v0 }
 0x342   :  { %2459 = vmatprep.subr.mxu0 %v2621_v0  ;;  %2505 = vmatprep.mubr.msk.f32.mxu1 %vm2622_vm0, %v2621_v0 }
 0x343   :  { %2460 = vmatpush3.msra.mxu0 %v1369_v1  ;;  %2496 = vmatpush3.msra.mxu1 %v1534_v2 }
 0x344   :  { %2461 = vmatprep.subr.mxu0 %v2621_v0  ;;  %2497 = vmatprep.subr.mxu1 %v2621_v0 }
 0x345   :  { %2462 = vmatpush3.msra.mxu0 %v1368_v3  ;;  %2498 = vmatpush3.msra.mxu1 %v1533_v4  ;;  %v1872_v4 = vpop.permute.xlu0 %1871 }
 0x346   :  { %2463 = vmatprep.subr.mxu0 %v2621_v0  ;;  %2499 = vmatprep.subr.mxu1 %v2621_v0 }
 0x347   :  { %2464 = vmatpush3.msra.mxu0 %v1367_v5  ;;  %2500 = vmatpush3.msra.mxu1 %v1532_v6 }
 0x348   :  { %2508 = vmatprep.subr.mxu0 %v2621_v0  ;;  %2501 = vmatprep.subr.mxu1 %v2621_v0 }
 0x349   :  { %2502 = vmatpush3.msra.mxu1 %v1531_v7 }
 0x34a   :  { %2503 = vmatprep.subr.mxu1 %v2621_v0 }
 0x34b   :  { %2504 = vmatpush3.msra.mxu1 %v1530_v8 }
 0x34c   :  { %2548 = vmatprep.subr.mxu1 %v2621_v0 }
 0x3e3   :  { %v1123_v9 = vpop.f32.mrf.mxu0 }
 0x3e4   :  { %v1127_v10 = vadd.f32 %v1123_v9, %v2918_v33  ;;  %v1698_v33 = vld [vmem:[#allocation2 + $0x428] sm:$0xff] }
 0x3e5   :  { %v2387_v11 = vpop.f32.mrf.mxu0 }
 0x3e7   :  { %v1286_v12 = vpop.f32.mrf.mxu1  ;;  %v1362_v13 = vpop.f32.mrf.mxu0 }
 0x3e8   :  { %v2973_v14 = vadd.f32 %v1286_v12, %v1127_v10  ;;  %2466 = vmatmul.mubr.f32.vlgmr.msra.gmra.mxu0 %v1362_v13 }
 0x3e9   :  { %2509 = vmatpush3.msra.mxu0 %v2743_v20  ;;  %v2427_v17 = vpop.f32.mrf.mxu1  ;;  %v2432_v18 = vpop.f32.mrf.mxu0  ;;  %2510 = vmatprep.mubr.msk.f32.mxu0 %vm2622_vm0, %v2621_v0  ;;  %v1706_v20 = vld [vmem:[#allocation2 + $0x468] sm:$0xff] }
 0x3ea   :  { %2513 = vmatprep.subr.mxu0 %v2621_v0 }
 0x3eb   :  { %v1525_v23 = vpop.f32.mrf.mxu1 }
 0x3ec   :  { %2506 = vmatmul.mubr.f32.vlgmr.msra.gmra.mxu1 %v1525_v23  ;;  %2511 = vmatmul.mubr.msk.f32.vlgmr.msra.gmra.mxu0 %vm70_vm1, %v1974_v21 }
 0x3ed   :  { %2514 = vmatpush3.msra.mxu0 %v1708_v22  ;;  %v2472_v25 = vpop.f32.mrf.mxu1  ;;  %2545 = vmatprep.mubr.msk.f32.mxu0 %vm2622_vm0, %v2621_v0 }
 0x3ee   :  { %2515 = vmatprep.subr.mxu0 %v2621_v0  ;;  %2580 = vmatprep.mubr.msk.f32.mxu1 %vm2622_vm0, %v2621_v0 }
 0x3ef   :  { %2516 = vmatpush3.msra.mxu0 %v1707_v24  ;;  %2549 = vmatpush3.msra.mxu1 %v1795_v39 }
 0x3f0   :  { %2517 = vmatprep.subr.mxu0 %v2621_v0  ;;  %2550 = vmatprep.subr.mxu1 %v2621_v0 }
 0x3f1   :  { %2518 = vmatpush3.msra.mxu0 %v1706_v20  ;;  %2551 = vmatpush3.msra.mxu1 %v1794_v40 }
 0x3f2   :  { %2519 = vmatprep.subr.mxu0 %v2621_v0  ;;  %2552 = vmatprep.subr.mxu1 %v2621_v0 }
 0x3f3   :  { %2520 = vmatpush3.msra.mxu0 %v1705_v26  ;;  %2553 = vmatpush3.msra.mxu1 %v1793_v41 }
 0x3f4   :  { %2521 = vmatprep.subr.mxu0 %v2621_v0  ;;  %2554 = vmatprep.subr.mxu1 %v2621_v0 }
 0x3f5   :  { %2522 = vmatpush3.msra.mxu0 %v1704_v27  ;;  %2555 = vmatpush3.msra.mxu1 %v1792_v42 }
 0x3f6   :  { %2523 = vmatprep.subr.mxu0 %v2621_v0  ;;  %2556 = vmatprep.subr.mxu1 %v2621_v0 }
 0x3f7   :  { %2524 = vmatpush3.msra.mxu0 %v1703_v28  ;;  %2557 = vmatpush3.msra.mxu1 %v1791_v43 }
 0x3f8   :  { %2525 = vmatprep.subr.mxu0 %v2621_v0  ;;  %2558 = vmatprep.subr.mxu1 %v2621_v0 }
 0x3f9   :  { %2526 = vmatpush3.msra.mxu0 %v1702_v29  ;;  %2559 = vmatpush3.msra.mxu1 %v1790_v44 }
 0x3fa   :  { %2527 = vmatprep.subr.mxu0 %v2621_v0  ;;  %2560 = vmatprep.subr.mxu1 %v2621_v0 }
 0x3fb   :  { %2528 = vmatpush3.msra.mxu0 %v1701_v30  ;;  %2561 = vmatpush3.msra.mxu1 %v1789_v45 }
 0x3fc   :  { %2529 = vmatprep.subr.mxu0 %v2621_v0  ;;  %2562 = vmatprep.subr.mxu1 %v2621_v0 }
 0x3fd   :  { %2530 = vmatpush3.msra.mxu0 %v1700_v31  ;;  %2563 = vmatpush3.msra.mxu1 %v1788_v46 }
 0x3fe   :  { %2531 = vmatprep.subr.mxu0 %v2621_v0  ;;  %2564 = vmatprep.subr.mxu1 %v2621_v0 }
 0x3ff   :  { %2532 = vmatpush3.msra.mxu0 %v1699_v32  ;;  %2565 = vmatpush3.msra.mxu1 %v1787_v47 }
 0x400   :  { %2533 = vmatprep.subr.mxu0 %v2621_v0  ;;  %2566 = vmatprep.subr.mxu1 %v2621_v0 }
 0x401   :  { %2534 = vmatpush3.msra.mxu0 %v1698_v33  ;;  %2567 = vmatpush3.msra.mxu1 %v1786_v48 }
 0x402   :  { %2535 = vmatprep.subr.mxu0 %v2621_v0  ;;  %2568 = vmatprep.subr.mxu1 %v2621_v0 }
 0x403   :  { %2536 = vmatpush3.msra.mxu0 %v1697_v34  ;;  %2569 = vmatpush3.msra.mxu1 %v1785_v49 }
 0x404   :  { %2537 = vmatprep.subr.mxu0 %v2621_v0  ;;  %2570 = vmatprep.subr.mxu1 %v2621_v0 }
 0x405   :  { %2538 = vmatpush3.msra.mxu0 %v1696_v35  ;;  %2571 = vmatpush3.msra.mxu1 %v1784_v50 }
 0x406   :  { %2539 = vmatprep.subr.mxu0 %v2621_v0  ;;  %2572 = vmatprep.subr.mxu1 %v2621_v0 }
 0x407   :  { %2540 = vmatpush3.msra.mxu0 %v1695_v36  ;;  %2573 = vmatpush3.msra.mxu1 %v1783_v51 }
 0x408   :  { %2541 = vmatprep.subr.mxu0 %v2621_v0  ;;  %2574 = vmatprep.subr.mxu1 %v2621_v0 }
 0x409   :  { %2542 = vmatpush3.msra.mxu0 %v1694_v37  ;;  %2575 = vmatpush3.msra.mxu1 %v1782_v52 }
 0x40a   :  { %2543 = vmatprep.subr.mxu0 %v2621_v0  ;;  %2576 = vmatprep.subr.mxu1 %v2621_v0 }
 0x40b   :  { %2544 = vmatpush3.msra.mxu0 %v1693_v38  ;;  %2577 = vmatpush3.msra.mxu1 %v1781_v62 }
 0x40c   :  { %2583 = vmatprep.subr.mxu0 %v2621_v0  ;;  %2578 = vmatprep.subr.mxu1 %v2621_v0 }
 0x40d   :  { %2579 = vmatpush3.msra.mxu1 %v1780_v15 }
 0x4a8   :  { %v1449_v53 = vpop.f32.mrf.mxu0 }
 0x4a9   :  { %v1453_v54 = vadd.f32 %v1449_v53, %v2973_v14 }
 0x4aa   :  { %v2467_v55 = vpop.f32.mrf.mxu0 }
 0x4ac   :  { %v1612_v56 = vpop.f32.mrf.mxu1  ;;  %v1688_v57 = vpop.f32.mrf.mxu0 }
 0x4ad   :  { %v1616_v58 = vadd.f32 %v1612_v56, %v1453_v54  ;;  %2546 = vmatmul.mubr.f32.vlgmr.msra.gmra.mxu0 %v1688_v57 }
 0x4ae   :  { %2584 = vmatpush3.msra.mxu0 %v227_v19  ;;  %v2512_v59 = vpop.f32.mrf.mxu0  ;;  %2585 = vmatprep.mubr.msk.f32.mxu0 %vm2622_vm0, %v2621_v0  ;;  %v2507_v61 = vpop.f32.mrf.mxu1 }
 0x4b1   :  { %2586 = vmatmul.mubr.msk.f32.vlgmr.msra.gmra.mxu0 %vm70_vm1, %v1867_v60 }
 0x56d   :  { %v1775_v19 = vpop.f32.mrf.mxu0 }
 0x56e   :  { %v1779_v63 = vadd.f32 %v1775_v19, %v1616_v58 }
 0x56f   :  { %v2547_v1 = vpop.f32.mrf.mxu0 }
 0x570   :  { %1948 = vst [vmem:[%s3099_s14] sm:$0xff] %v1779_v63  ;;  %2581 = vmatmul.mubr.f32.vlgmr.msra.gmra.mxu1 %v1779_v63 }
 0x571   :  { %v1943_v2 = vpop.f32.mrf.mxu0 }
 0x572   :  { %v1944_v6 = vadd.f32 %v1943_v2, %v1872_v4 }
 0x573   :  { %v2587_v3 = vpop.f32.mrf.mxu0 }
 0x630   :  { %v1862_v5 = vpop.f32.mrf.mxu1 }
 0x631   :  { %v1866_v0 = vadd.f32 %v1862_v5, %v2739_v16 }
 0x632   :  { %v2582_v7 = vpop.f32.mrf.mxu1 }
 0x633   :  { %v1947_v8 = vadd.f32 %v1944_v6, %v1866_v0  ;;  %1949 = vst [vmem:[%s3099_s14 + $0x8] sm:$0xff] %v1866_v0 }
 0x635   :  { %1950 = vst [vmem:[%s3099_s14 + $0x10] sm:$0xff] %v1947_v8 }
 0x636   :  { %1955 = vsyncpa [#allocation3], 1 }

</bundles_post_ra>
